<compile_context>
chip_gen: v7x
topology: tpu7x:2x2x1
jax: 0.10.0
libtpu: 0.0.40
codegen_flags: <defaults>
</compile_context>

<pallas_src>
import jax
import jax.numpy as jnp
from jax.experimental import pallas as pl
from jax.experimental.pallas import tpu as pltpu


def _round_up(x: int, m: int) -> int:
    return ((x + m - 1) // m) * m


def _decoder_kernel(x_ref, w_ref, b_ref, o_ref):
    # MXU: bf16 operands (in-kernel VPU cast), f32 accumulation.
    y = jnp.dot(
        x_ref[...].astype(jnp.bfloat16),
        w_ref[...].astype(jnp.bfloat16),
        preferred_element_type=jnp.float32,
    )
    # VPU/EUP epilogue in f32 (bias is (1, TN) -> broadcasts over the batch tile).
    y = y + b_ref[...]
    o_ref[...] = jax.nn.sigmoid(y).astype(o_ref.dtype)


def decoder_forward(x, weight, bias, *, block_b=512, block_n=512):
    """x: (B, E) f32; weight: (E, N) f32; bias: (N,) f32  ->  (B, N) f32."""
    B, E = x.shape
    E2, N = weight.shape
    assert E == E2 and bias.shape == (N,)
    out_dtype = x.dtype

    # Tile sizes: lane-dense N tiles (multiple of 128), sublane-aligned batch
    # tiles (multiple of 8).  Clamp to the (padded) problem size for tiny inputs.
    TN = min(_round_up(block_n, 128), _round_up(N, 128))
    TB = min(_round_up(block_b, 8), _round_up(B, 8))
    N_pad = _round_up(N, TN)
    B_pad = _round_up(B, TB)

    # Wrapper-side zero padding only (no dtype change -> no extra HBM pass when
    # shapes are already aligned, jnp.pad with zero widths is a no-op).
    x_p = jnp.pad(x, ((0, B_pad - B), (0, 0)))
    w_p = jnp.pad(weight, ((0, 0), (0, N_pad - N)))
    b_p = jnp.pad(bias.astype(jnp.float32), (0, N_pad - N)).reshape(1, N_pad)

    grid = (B_pad // TB, N_pad // TN)

    # Explicit VMEM budget: double-buffered x / W / bias input tiles + output tile
    # (all f32) plus headroom; clamped to stay valid on v7x's 64 MiB physical VMEM.
    needed = 2 * (TB * E * 4 + E * TN * 4 + TN * 4 + TB * TN * 4)
    vmem_limit = int(min(max(needed + (2 << 20), 16 << 20), 48 << 20))

    out_padded = pl.pallas_call(
        _decoder_kernel,
        out_shape=jax.ShapeDtypeStruct((B_pad, N_pad), out_dtype),
        grid_spec=pltpu.PrefetchScalarGridSpec(
            num_scalar_prefetch=0,
            grid=grid,
            in_specs=[
                pl.BlockSpec((TB, E), lambda i, j: (i, 0)),   # x: varies with batch tile
                pl.BlockSpec((E, TN), lambda i, j: (0, j)),   # W: varies with N tile only
                pl.BlockSpec((1, TN), lambda i, j: (0, j)),   # bias: resident across batch axis
            ],
            out_specs=pl.BlockSpec((TB, TN), lambda i, j: (i, j)),
        ),
        compiler_params=pltpu.CompilerParams(
            dimension_semantics=("parallel", "parallel"),
            vmem_limit_bytes=vmem_limit,
        ),
    )(x_p, w_p, b_p)

    # Drop padding (padded columns contain sigmoid(0)=0.5; never exposed).
    return out_padded[:B, :N]


def decoder_reference_f32(x, weight, bias):
    return jax.nn.sigmoid(x @ weight + bias)


def decoder_reference_bf16(x, weight, bias):
    # Mirrors the kernel's numerics: bf16 operands, f32 accumulation + epilogue.
    y = jnp.dot(x.astype(jnp.bfloat16), weight.astype(jnp.bfloat16),
                preferred_element_type=jnp.float32)
    return jax.nn.sigmoid(y + bias.astype(jnp.float32))


if __name__ == "__main__":
    # Small shapes consistent with the module: Decoder(embedding_size=32, input_size=64)
    batch, embedding_size, input_size = 8, 32, 64

    key = jax.random.PRNGKey(0)
    kx, kw, kb = jax.random.split(key, 3)

    # Deterministic init mimicking nn.Linear default: U(-1/sqrt(fan_in), 1/sqrt(fan_in))
    bound = 1.0 / (embedding_size ** 0.5)
    weight = jax.random.uniform(kw, (embedding_size, input_size),
                                jnp.float32, minval=-bound, maxval=bound)
    bias = jax.random.uniform(kb, (input_size,), jnp.float32,
                              minval=-bound, maxval=bound)
    x = jax.random.normal(kx, (batch, embedding_size), jnp.float32)

    out = decoder_forward(x, weight, bias)
    out = jax.block_until_ready(out)
    assert out.shape == (batch, input_size)

    # Tight check vs. a reference that uses the same bf16-operand / f32-acc numerics.
    ref_bf16 = decoder_reference_bf16(x, weight, bias)
    assert jnp.allclose(out, ref_bf16, atol=1e-3, rtol=1e-3)

    # Loose check vs. the pure-f32 reference (bf16 operand quantization bound).
    ref_f32 = decoder_reference_f32(x, weight, bias)
    assert jnp.allclose(out, ref_f32, atol=2e-2, rtol=2e-2)

    print("KERNEL_OK")
</pallas_src>

<mosaic_0001>
module attributes {stable_mosaic.version = 11 : i64} {
  func.func @_decoder_kernel(%arg0: i32, %arg1: i32, %arg2: memref<8x32xf32, #tpu.memory_space<vmem>>, %arg3: memref<32x128xf32, #tpu.memory_space<vmem>>, %arg4: memref<1x128xf32, #tpu.memory_space<vmem>>, %arg5: memref<8x128xf32, #tpu.memory_space<vmem>>) attributes {dimension_semantics = [#tpu.dimension_semantics<parallel>, #tpu.dimension_semantics<parallel>], iteration_bounds = array<i64: 1, 1>, scalar_prefetch = 0 : i64, scratch_operands = 0 : i64, tpu.core_type = #tpu.core_type<tc>, window_params = [{transform_indices = @transform_0, window_bounds = array<i64: 8, 32>}, {transform_indices = @transform_1, window_bounds = array<i64: 32, 128>}, {transform_indices = @transform_2, window_bounds = array<i64: 1, 128>}, {transform_indices = @transform_3, window_bounds = array<i64: 8, 128>}]} {
    %c0 = arith.constant 0 : index
    %c0_0 = arith.constant 0 : index
    %0 = vector.load %arg2[%c0, %c0_0] : memref<8x32xf32, #tpu.memory_space<vmem>>, vector<8x32xf32>
    %1 = arith.truncf %0 : vector<8x32xf32> to vector<8x32xbf16>
    %c0_1 = arith.constant 0 : index
    %c0_2 = arith.constant 0 : index
    %2 = vector.load %arg3[%c0_1, %c0_2] : memref<32x128xf32, #tpu.memory_space<vmem>>, vector<32x128xf32>
    %3 = arith.truncf %2 : vector<32x128xf32> to vector<32x128xbf16>
    %cst = arith.constant dense<0.000000e+00> : vector<8x128xf32>
    %4 = tpu.matmul %1, %3, %cst {dimension_numbers = #tpu.dot_dimension_numbers<[1], [0], [0], [1], [0, 0, 1, 1], [], []>} : vector<8x32xbf16>, vector<32x128xbf16>, vector<8x128xf32> -> vector<8x128xf32>
    %c0_3 = arith.constant 0 : index
    %c0_4 = arith.constant 0 : index
    %5 = vector.load %arg4[%c0_3, %c0_4] : memref<1x128xf32, #tpu.memory_space<vmem>>, vector<1x128xf32>
    %6 = vector.broadcast %5 : vector<1x128xf32> to vector<8x128xf32>
    %7 = arith.addf %4, %6 : vector<8x128xf32>
    %8 = arith.negf %7 : vector<8x128xf32>
    %9 = math.exp %8 : vector<8x128xf32>
    %cst_5 = arith.constant 1.000000e+00 : f32
    %10 = vector.broadcast %cst_5 : f32 to vector<8x128xf32>
    %11 = arith.addf %10, %9 : vector<8x128xf32>
    %12 = arith.divf %10, %11 : vector<8x128xf32>
    %c0_6 = arith.constant 0 : index
    %c0_7 = arith.constant 0 : index
    %13 = vector.load %arg5[%c0_6, %c0_7] : memref<8x128xf32, #tpu.memory_space<vmem>>, vector<8x128xf32>
    tpu.vector_store %arg5[%c0_6, %c0_7], %12 {strides = array<i32>} : memref<8x128xf32, #tpu.memory_space<vmem>>, vector<8x128xf32>,
    return
  }
  func.func @transform_0(%arg0: i32, %arg1: i32) -> (i32, i32) {
    %c0_i32 = arith.constant 0 : i32
    %c0_i32_0 = arith.constant 0 : i32
    return %arg0, %c0_i32 : i32, i32
  }
  func.func @transform_1(%arg0: i32, %arg1: i32) -> (i32, i32) {
    %c0_i32 = arith.constant 0 : i32
    %c0_i32_0 = arith.constant 0 : i32
    return %c0_i32, %arg1 : i32, i32
  }
  func.func @transform_2(%arg0: i32, %arg1: i32) -> (i32, i32) {
    %c0_i32 = arith.constant 0 : i32
    %c0_i32_0 = arith.constant 0 : i32
    return %c0_i32, %arg1 : i32, i32
  }
  func.func @transform_3(%arg0: i32, %arg1: i32) -> (i32, i32) {
    %c0_i32 = arith.constant 0 : i32
    return %arg0, %arg1 : i32, i32
  }
}

</mosaic_0001>

<bundles_post_ra>
// kernel: tpu_custom_call.1
= control target key start
LH: loop header
LB: loop body
LE: loop exit
PB: predicated region body
PF: predicated region fallthrough
CT: control target
= control target key end

     0   :  { %8 = vsyncpa [#allocation3], 0  ;;  %s294_s0 = inlined_call_operand.hbm [shape: f32[8,32], index: 0, kind: input, shape index: {}]   ;;  %s295_s1 = inlined_call_operand.hbm [shape: f32[32,128], index: 1, kind: input, shape index: {}]   ;;  %s296_s2 = inlined_call_operand.vmem [shape: f32[1,128], index: 2, kind: input, shape index: {}]   ;;  %s297_s3 = inlined_call_operand.hbm [shape: f32[8,128], index: 3, kind: output, shape index: {}]  }
   0x1   :  { %9 = vsyncpa [#allocation6], 0 }
   0x2   :  { %10 = vsyncpa [#allocation4], 0  ;;  %s221_s12 = smov [#allocation2]   ;;  %s222_s14 = smov [#allocation5]  }
   0x3   :  { %s17_s13 = sshll.u32 %s221_s12, 4  ;;  %s26_s15 = sshll.u32 %s222_s14, 4  ;;  %s18_s13 = int_to_ptr.vmem [resolvable:$true] %s17_s13  ;;  %s248_s15 = int_to_ptr.vmem [resolvable:$true] %s26_s15 }
   0x4   :  { %s149_s18 = scalar_lea.hbm %s294_s0, 128 }
   0x5   :  { %p150_p0 = scmp.ne.s32.totalorder %s294_s0, %s149_s18  ;;  %p153_p1 = scmp.lt.u32.totalorder %s149_s18, %s294_s0 }
   0x7   :  { %p155_p2 = pnand %p153_p1, %p150_p0 }
   0x9   :  { %158 = shalt.err (!%p155_p2)
}
   0xa   :  { %s159_s23 = scalar_lea.vmem %s18_s13, 128  ;;  %p164_p4 = scmp.lt.s32.totalorder %s18_s13, %s18_s13 }
   0xb   :  { %p160_p3 = scmp.ne.s32.totalorder %s18_s13, %s159_s23  ;;  %p165_p5 = scmp.lt.s32.totalorder %s159_s23, %s159_s23 }
   0xd   :  { %p166_p6 = por %p165_p5, %p164_p4 }
   0xf   :  { %p167_p7 = pnand %p166_p6, %p160_p3 }
  0x11   :  { %170 = shalt.err (!%p167_p7)
}
  0x12   :  { %20 = dma.hbm_to_vmem [thread:$0]  %s294_s0, 128, %s18_s13, [#allocation3]  }
  0x13   :  { %s171_s28 = scalar_lea.hbm %s295_s1, 512 }
  0x14   :  { %p172_p8 = scmp.ne.s32.totalorder %s295_s1, %s171_s28  ;;  %p175_p9 = scmp.lt.u32.totalorder %s171_s28, %s295_s1 }
  0x16   :  { %p177_p10 = pnand %p175_p9, %p172_p8 }
  0x18   :  { %180 = shalt.err (!%p177_p10)
}
  0x19   :  { %s181_s6 = scalar_lea.vmem %s248_s15, 512  ;;  %p186_p12 = scmp.lt.s32.totalorder %s248_s15, %s248_s15 }
  0x1a   :  { %p182_p11 = scmp.ne.s32.totalorder %s248_s15, %s181_s6  ;;  %p187_p13 = scmp.lt.s32.totalorder %s181_s6, %s181_s6 }
  0x1c   :  { %p188_p0 = por %p187_p13, %p186_p12 }
  0x1e   :  { %p189_p1 = pnand %p188_p0, %p182_p11 }
  0x20   :  { %192 = shalt.err (!%p189_p1)
}
  0x21   :  { %s223_s0 = smov 128   ;;  %s224_s7 = smov 8  }
  0x22   :  { %32 = dma.hbm_to_vmem [thread:$0]  %s295_s1, 512, %s248_s15, [#allocation6], %s223_s0, %s223_s0, %s224_s7  }
  0x23   :  { %215 = dma.done.wait [#allocation3], 128  }
  0x24   :  { %216 = vsyncadd [#allocation3], 4294967168 }
  0x25   :  { %217 = dma.done.wait [#allocation6], 512  }
  0x26   :  { %218 = vsyncadd [#allocation6], 4294966784  ;;  %v225_v0 = vmov 0.0   ;;  %vm226_vm0 = vmmov 0   ;;  %v44_v1 = vld [vmem:[#allocation5] sm:$0xff]  ;;  %v45_v2 = vld [vmem:[#allocation5 + $0x8] sm:$0xff] }
  0x27   :  { %130 = vmatprep.subr.bf16.mxu0 %v225_v0  ;;  %134 = vmatprep.mubr.msk.bf16.mxu0 %vm226_vm0, %v225_v0  ;;  %v46_v3 = vld [vmem:[#allocation5 + $0x10] sm:$0xff]  ;;  %v48_v4 = vpack.c.bf16 %v45_v2, %v44_v1  ;;  %v47_v5 = vld [vmem:[#allocation5 + $0x18] sm:$0xff]  ;;  %vm57_vm1 = vcmask 261120   ;;  %s227_s11 = smov [#allocation7]  }
  0x28   :  { %v49_v6 = vpack.c.bf16 %v47_v5, %v46_v3  ;;  %v42_v7 = vld [vmem:[#allocation2] sm:$0xff]  ;;  %s114_s12 = sshll.u32 %s227_s11, 4  ;;  %s115_s12 = int_to_ptr.vmem [resolvable:$true] %s114_s12 }
  0x29   :  { %131 = vmatpush3.bf16.msra.mxu0 %v48_v4  ;;  %v43_v8 = vpack.c.bf16 %v42_v7, %v42_v7  ;;  %v124_v9 = vld [vmem:[%s296_s2] ss:$0 sm:$0xff]  ;;  %s193_s13 = scalar_lea.vmem %s115_s12, 128  ;;  %p198_p3 = scmp.lt.s32.totalorder %s115_s12, %s115_s12 }
  0x2a   :  { %132 = vmatprep.subr.bf16.mxu0 %v225_v0  ;;  %p194_p2 = scmp.ne.s32.totalorder %s115_s12, %s193_s13  ;;  %p199_p4 = scmp.lt.s32.totalorder %s193_s13, %s193_s13 }
  0x2c   :  { %p200_p5 = por %p199_p4, %p198_p3 }
  0x2d   :  { %133 = vmatpush3.bf16.msra.mxu0 %v49_v6 }
  0x2e   :  { %p201_p6 = pnand %p200_p5, %p194_p2 }
  0x30   :  { %135 = vmatmul.mubr.msk.bf16.vlgmr.msra.gmra.mrb[0].mxu0 %vm57_vm1, %v43_v8 }
 0x103   :  { %v95_v10 = vpop.f32.mrb[0].mxu0 }
 0x104   :  { %v96_v11 = vadd.f32 %v124_v9, %v95_v10  ;;  %v136_v12 = vpop.f32.mrb[1].mxu0 }
 0x105   :  { %v98_v13 = vpop.f32.mrb[2].mxu0 }
 0x106   :  { %v126_v14 = vmul.f32 -1.442695, %v96_v11  ;;  %v137_v15 = vpop.f32.mrb[3].mxu0 }
 0x108   :  { %145 = vpow2.f32 %v126_v14 }
 0x112   :  { %v146_v16 = vpop.eup %145 }
 0x113   :  { %v104_v17 = vadd.f32 1.0, %v146_v16 }
 0x115   :  { %147 = vrcp.f32 %v104_v17 }
 0x11f   :  { %v148_v18 = vpop.eup %147 }
 0x120   :  { %107 = vst [vmem:[#allocation7] sm:$0xff] %v148_v18 }
 0x121   :  { %204 = shalt.err (!%p201_p6)
}
 0x122   :  { %s205_s15 = scalar_lea.hbm %s297_s3, 128 }
 0x123   :  { %p206_p7 = scmp.ne.s32.totalorder %s297_s3, %s205_s15  ;;  %p209_p8 = scmp.lt.u32.totalorder %s205_s15, %s297_s3 }
 0x125   :  { %p211_p9 = pnand %p209_p8, %p206_p7 }
 0x127   :  { %214 = shalt.err (!%p211_p9)
}
 0x128   :  { %117 = dma.vmem_to_hbm [thread:$0]  %s115_s12, 128, %s297_s3, [#allocation4]  }
 0x129   :  { %219 = dma.done.wait [#allocation4], 128  }
 0x12a   :  { %220 = vsyncadd [#allocation4], 4294967168 }
 0x12b   :  { %121 = vsyncpa [#allocation3], 1 }
 0x12c   :  { %122 = vsyncpa [#allocation6], 1 }
 0x12d   :  { %123 = vsyncpa [#allocation4], 1 }

</bundles_post_ra>
